<compile_context>
chip_gen: v7x
topology: tpu7x:2x2x1
jax: 0.10.0
libtpu: 0.0.40
codegen_flags: <defaults>
</compile_context>

<pallas_src>
import functools

import jax
import jax.numpy as jnp
from jax.experimental import pallas as pl
from jax.experimental.pallas import tpu as pltpu


def _kl_loss_tile_kernel(student_ref, teacher_ref, out_ref, *,
                         inv_temperature, batch, tile_rows, tiles_per_split):
    c = pl.program_id(0)   # TC-split index   ("parallel")
    i = pl.program_id(1)   # tile within split ("arbitrary", accumulated)

    tile_idx = c * tiles_per_split + i
    row_base = tile_idx * tile_rows

    # Logical-row validity mask: handles the ragged last tile and fully
    # overhanging tiles (odd tile counts) whose input block index is clamped.
    row_ids = row_base + jax.lax.broadcasted_iota(jnp.int32, (tile_rows, 1), 0)
    valid = row_ids < batch

    s = student_ref[...].astype(jnp.float32) * inv_temperature
    t = teacher_ref[...].astype(jnp.float32) * inv_temperature
    # Neutralize padded / garbage rows before any transcendental touches them.
    s = jnp.where(valid, s, 0.0)
    t = jnp.where(valid, t, 0.0)

    # Student log_softmax over the class axis (last dim).
    s_max = jnp.max(s, axis=-1, keepdims=True)
    s_sh = s - s_max
    log_p = s_sh - jnp.log(jnp.sum(jnp.exp(s_sh), axis=-1, keepdims=True))

    # Teacher softmax + 1e-7 (NOT renormalized, exactly as in the PyTorch ref).
    # One reciprocal per row (EUP) + per-element VPU multiply, not a divide.
    t_max = jnp.max(t, axis=-1, keepdims=True)
    t_exp = jnp.exp(t - t_max)
    row_inv = pl.reciprocal(jnp.sum(t_exp, axis=-1, keepdims=True))
    q = t_exp * row_inv + 1e-7

    # KLDiv term; padded rows would contribute ~C*1e-7 each, so mask them out.
    kl = q * (jnp.log(q) - log_p)
    kl = jnp.where(valid, kl, 0.0)
    tile_sum = jnp.sum(kl)  # raw partial sum; T^2/B scaling hoisted to wrapper

    @pl.when(i == 0)
    def _():
        out_ref[...] = jnp.zeros_like(out_ref)
    out_ref[...] += tile_sum  # lane-broadcast accumulate into (1,1,128) block


def kl_loss(output_batch, teacher_outputs, temperature=1.0,
            target_tile_bytes=1 << 20):
    """Pallas TPU implementation of KL_Loss.forward. Returns a scalar f32."""
    assert output_batch.shape == teacher_outputs.shape
    assert output_batch.ndim == 2
    B, C = output_batch.shape
    T = float(temperature)

    # ---- tile sizing: ~target_tile_bytes of f32 per input tile ------------
    # TODO(synk): for vocab-sized C (32k+), tile C with an online logsumexp
    # instead of shrinking the row tile.
    tb = max(16, target_tile_bytes // (C * 4))
    if tb >= B:
        tb = B                                # single full-extent row block
    else:
        tb = max(16, (tb // 16) * 16)         # sublane-aligned (f32/bf16 safe)
    num_tiles = pl.cdiv(B, tb)

    # v7x: split tiles over both TensorCores; harmless on 1-TC chips.
    nsplit = 2 if num_tiles >= 2 else 1
    tiles_per_split = pl.cdiv(num_tiles, nsplit)

    def in_map(c, i):
        # Clamp overhanging block indices in-bounds; the kernel masks their
        # logical rows so they contribute nothing.
        return (jnp.minimum(c * tiles_per_split + i, num_tiles - 1), 0)

    kernel = functools.partial(
        _kl_loss_tile_kernel,
        inv_temperature=1.0 / T,
        batch=B,
        tile_rows=tb,
        tiles_per_split=tiles_per_split,
    )

    partials = pl.pallas_call(
        kernel,
        out_shape=jax.ShapeDtypeStruct((nsplit, 1, 128), jnp.float32),
        grid=(nsplit, tiles_per_split),
        in_specs=[
            pl.BlockSpec((tb, C), in_map),
            pl.BlockSpec((tb, C), in_map),
        ],
        out_specs=pl.BlockSpec((1, 1, 128), lambda c, i: (c, 0, 0)),
        compiler_params=pltpu.CompilerParams(
            dimension_semantics=("parallel", "arbitrary"),
            vmem_limit_bytes=32 * 1024 * 1024,
        ),
    )(output_batch, teacher_outputs)

    # Hoisted scalar epilogue: T^2 * sum / B, applied once.
    return (T * T / B) * jnp.sum(partials[:, 0, 0])


def _kl_loss_ref(output_batch, teacher_outputs, temperature=1.0):
    """Plain-JAX reference for sanity checking."""
    T = temperature
    log_p = jax.nn.log_softmax(output_batch.astype(jnp.float32) / T, axis=1)
    q = jax.nn.softmax(teacher_outputs.astype(jnp.float32) / T, axis=1) + 1e-7
    B = output_batch.shape[0]
    return T * T * jnp.sum(q * (jnp.log(q) - log_p)) / B


if __name__ == "__main__":
    key = jax.random.PRNGKey(0)
    k1, k2, k3, k4 = jax.random.split(key, 4)

    # Case 1: small f32 logits, single tile / single split.
    B1, C1 = 8, 128
    s1 = jax.random.normal(k1, (B1, C1), dtype=jnp.float32) * 3.0
    t1 = jax.random.normal(k2, (B1, C1), dtype=jnp.float32) * 3.0
    got1 = jax.block_until_ready(kl_loss(s1, t1, temperature=2.0))
    ref1 = jax.block_until_ready(_kl_loss_ref(s1, t1, temperature=2.0))
    assert jnp.allclose(got1, ref1, rtol=1e-4, atol=1e-6), (got1, ref1)

    # Case 2: bf16 logits, tiny tiles to exercise multi-tile pipeline, the
    # 2-way core split, a ragged last tile, and a clamped overhang tile.
    B2, C2 = 80, 128
    s2 = (jax.random.normal(k3, (B2, C2), dtype=jnp.float32) * 3.0).astype(jnp.bfloat16)
    t2 = (jax.random.normal(k4, (B2, C2), dtype=jnp.float32) * 3.0).astype(jnp.bfloat16)
    got2 = jax.block_until_ready(
        kl_loss(s2, t2, temperature=1.0, target_tile_bytes=16 * 1024))
    ref2 = jax.block_until_ready(_kl_loss_ref(s2, t2, temperature=1.0))
    assert jnp.allclose(got2, ref2, rtol=1e-3, atol=1e-5), (got2, ref2)

    print("KERNEL_OK")
</pallas_src>

<mosaic_0001>
module attributes {stable_mosaic.version = 11 : i64} {
  func.func @_kl_loss_tile_kernel(%arg0: i32, %arg1: i32, %arg2: memref<8x128xf32, #tpu.memory_space<vmem>>, %arg3: memref<8x128xf32, #tpu.memory_space<vmem>>, %arg4: memref<1x1x128xf32, #tpu.memory_space<vmem>>) attributes {dimension_semantics = [#tpu.dimension_semantics<parallel>, #tpu.dimension_semantics<arbitrary>], iteration_bounds = array<i64: 1, 1>, scalar_prefetch = 0 : i64, scratch_operands = 0 : i64, tpu.core_type = #tpu.core_type<tc>, window_params = [{transform_indices = @transform_0, window_bounds = array<i64: 8, 128>}, {transform_indices = @transform_1, window_bounds = array<i64: 8, 128>}, {transform_indices = @transform_2, window_bounds = array<i64: 1, 1, 128>}]} {
    %c1_i32 = arith.constant 1 : i32
    %0 = arith.muli %arg0, %c1_i32 : i32
    %1 = arith.addi %0, %arg1 : i32
    %c8_i32 = arith.constant 8 : i32
    %2 = arith.muli %1, %c8_i32 : i32
    %3 = tpu.iota {dimensions = array<i32: 0>} : vector<8x1xi32>
    %4 = vector.broadcast %2 : i32 to vector<8x1xi32>
    %5 = arith.addi %4, %3 : vector<8x1xi32>
    %c8_i32_0 = arith.constant 8 : i32
    %6 = vector.broadcast %c8_i32_0 : i32 to vector<8x1xi32>
    %7 = arith.cmpi slt, %5, %6 : vector<8x1xi32>
    %c0 = arith.constant 0 : index
    %c0_1 = arith.constant 0 : index
    %8 = vector.load %arg2[%c0, %c0_1] : memref<8x128xf32, #tpu.memory_space<vmem>>, vector<8x128xf32>
    %cst = arith.constant 5.000000e-01 : f32
    %9 = vector.broadcast %cst : f32 to vector<8x128xf32>
    %10 = arith.mulf %8, %9 : vector<8x128xf32>
    %c0_2 = arith.constant 0 : index
    %c0_3 = arith.constant 0 : index
    %11 = vector.load %arg3[%c0_2, %c0_3] : memref<8x128xf32, #tpu.memory_space<vmem>>, vector<8x128xf32>
    %cst_4 = arith.constant 5.000000e-01 : f32
    %12 = vector.broadcast %cst_4 : f32 to vector<8x128xf32>
    %13 = arith.mulf %11, %12 : vector<8x128xf32>
    %cst_5 = arith.constant 0.000000e+00 : f32
    %14 = vector.shape_cast %7 : vector<8x1xi1> to vector<8x1xi1>
    %15 = vector.broadcast %14 : vector<8x1xi1> to vector<8x128xi1>
    %16 = vector.broadcast %cst_5 : f32 to vector<8x128xf32>
    %17 = arith.select %15, %10, %16 : vector<8x128xi1>, vector<8x128xf32>
    %cst_6 = arith.constant 0.000000e+00 : f32
    %18 = vector.shape_cast %7 : vector<8x1xi1> to vector<8x1xi1>
    %19 = vector.broadcast %18 : vector<8x1xi1> to vector<8x128xi1>
    %20 = vector.broadcast %cst_6 : f32 to vector<8x128xf32>
    %21 = arith.select %19, %13, %20 : vector<8x128xi1>, vector<8x128xf32>
    %cst_7 = arith.constant dense<0xFF800000> : vector<8xf32>
    %22 = vector.multi_reduction <maximumf>, %17, %cst_7 [1] : vector<8x128xf32> to vector<8xf32>
    %23 = vector.shape_cast %22 : vector<8xf32> to vector<8x1xf32>
    %24 = vector.broadcast %23 : vector<8x1xf32> to vector<8x128xf32>
    %25 = arith.subf %17, %24 : vector<8x128xf32>
    %26 = math.exp %25 : vector<8x128xf32>
    %cst_8 = arith.constant dense<0.000000e+00> : vector<8xf32>
    %27 = vector.multi_reduction <add>, %26, %cst_8 [1] : vector<8x128xf32> to vector<8xf32>
    %28 = vector.shape_cast %27 : vector<8xf32> to vector<8x1xf32>
    %29 = math.log %28 : vector<8x1xf32>
    %30 = vector.broadcast %29 : vector<8x1xf32> to vector<8x128xf32>
    %31 = arith.subf %25, %30 : vector<8x128xf32>
    %cst_9 = arith.constant dense<0xFF800000> : vector<8xf32>
    %32 = vector.multi_reduction <maximumf>, %21, %cst_9 [1] : vector<8x128xf32> to vector<8xf32>
    %33 = vector.shape_cast %32 : vector<8xf32> to vector<8x1xf32>
    %34 = vector.broadcast %33 : vector<8x1xf32> to vector<8x128xf32>
    %35 = arith.subf %21, %34 : vector<8x128xf32>
    %36 = math.exp %35 : vector<8x128xf32>
    %cst_10 = arith.constant dense<0.000000e+00> : vector<8xf32>
    %37 = vector.multi_reduction <add>, %36, %cst_10 [1] : vector<8x128xf32> to vector<8xf32>
    %38 = vector.shape_cast %37 : vector<8xf32> to vector<8x1xf32>
    %39 = tpu.reciprocal %38 : vector<8x1xf32> -> vector<8x1xf32>
    %40 = vector.broadcast %39 : vector<8x1xf32> to vector<8x128xf32>
    %41 = arith.mulf %36, %40 : vector<8x128xf32>
    %cst_11 = arith.constant 1.000000e-07 : f32
    %42 = vector.broadcast %cst_11 : f32 to vector<8x128xf32>
    %43 = arith.addf %41, %42 : vector<8x128xf32>
    %44 = math.log %43 : vector<8x128xf32>
    %45 = arith.subf %44, %31 : vector<8x128xf32>
    %46 = arith.mulf %43, %45 : vector<8x128xf32>
    %cst_12 = arith.constant 0.000000e+00 : f32
    %47 = vector.shape_cast %7 : vector<8x1xi1> to vector<8x1xi1>
    %48 = vector.broadcast %47 : vector<8x1xi1> to vector<8x128xi1>
    %49 = vector.broadcast %cst_12 : f32 to vector<8x128xf32>
    %50 = arith.select %48, %46, %49 : vector<8x128xi1>, vector<8x128xf32>
    %51 = vector.shape_cast %50 : vector<8x128xf32> to vector<1x8x128xf32>
    %cst_13 = arith.constant dense<0.000000e+00> : vector<1xf32>
    %52 = vector.multi_reduction <add>, %51, %cst_13 [1, 2] : vector<1x8x128xf32> to vector<1xf32>
    %53 = vector.shape_cast %52 : vector<1xf32> to vector<1x1x1xf32>
    %54 = vector.extract %53[0, 0, 0] : f32 from vector<1x1x1xf32>
    %c0_i32 = arith.constant 0 : i32
    %55 = arith.cmpi eq, %arg1, %c0_i32 : i32
    %56 = arith.extui %55 : i1 to i32
    %c0_i32_14 = arith.constant 0 : i32
    %57 = arith.cmpi ne, %56, %c0_i32_14 : i32
    scf.if %57 {
      %cst_21 = arith.constant 0.000000e+00 : f32
      %62 = vector.broadcast %cst_21 : f32 to vector<1x1x128xf32>
      %c0_22 = arith.constant 0 : index
      %c0_23 = arith.constant 0 : index
      %c0_24 = arith.constant 0 : index
      %63 = vector.load %arg4[%c0_22, %c0_23, %c0_24] : memref<1x1x128xf32, #tpu.memory_space<vmem>>, vector<1x1x128xf32>
      tpu.vector_store %arg4[%c0_22, %c0_23, %c0_24], %62 {strides = array<i32>} : memref<1x1x128xf32, #tpu.memory_space<vmem>>, vector<1x1x128xf32>,
    } else {
    }
    %c0_15 = arith.constant 0 : index
    %c0_16 = arith.constant 0 : index
    %c0_17 = arith.constant 0 : index
    %58 = vector.load %arg4[%c0_15, %c0_16, %c0_17] : memref<1x1x128xf32, #tpu.memory_space<vmem>>, vector<1x1x128xf32>
    %59 = vector.broadcast %54 : f32 to vector<1x1x128xf32>
    %60 = arith.addf %58, %59 : vector<1x1x128xf32>
    %c0_18 = arith.constant 0 : index
    %c0_19 = arith.constant 0 : index
    %c0_20 = arith.constant 0 : index
    %61 = vector.load %arg4[%c0_18, %c0_19, %c0_20] : memref<1x1x128xf32, #tpu.memory_space<vmem>>, vector<1x1x128xf32>
    tpu.vector_store %arg4[%c0_18, %c0_19, %c0_20], %60 {strides = array<i32>} : memref<1x1x128xf32, #tpu.memory_space<vmem>>, vector<1x1x128xf32>,
    return
  }
  func.func @transform_0(%arg0: i32, %arg1: i32) -> (i32, i32) {
    %c1_i32 = arith.constant 1 : i32
    %0 = arith.muli %arg0, %c1_i32 : i32
    %1 = arith.addi %0, %arg1 : i32
    %c0_i32 = arith.constant 0 : i32
    %2 = arith.minsi %1, %c0_i32 : i32
    %c0_i32_0 = arith.constant 0 : i32
    %c0_i32_1 = arith.constant 0 : i32
    return %2, %c0_i32_0 : i32, i32
  }
  func.func @transform_1(%arg0: i32, %arg1: i32) -> (i32, i32) {
    %c1_i32 = arith.constant 1 : i32
    %0 = arith.muli %arg0, %c1_i32 : i32
    %1 = arith.addi %0, %arg1 : i32
    %c0_i32 = arith.constant 0 : i32
    %2 = arith.minsi %1, %c0_i32 : i32
    %c0_i32_0 = arith.constant 0 : i32
    %c0_i32_1 = arith.constant 0 : i32
    return %2, %c0_i32_0 : i32, i32
  }
  func.func @transform_2(%arg0: i32, %arg1: i32) -> (i32, i32, i32) {
    %c0_i32 = arith.constant 0 : i32
    %c0_i32_0 = arith.constant 0 : i32
    %c0_i32_1 = arith.constant 0 : i32
    return %arg0, %c0_i32, %c0_i32_0 : i32, i32, i32
  }
}

</mosaic_0001>

<bundles_post_ra>
// kernel: tpu_custom_call.1
= control target key start
LH: loop header
LB: loop body
LE: loop exit
PB: predicated region body
PF: predicated region fallthrough
CT: control target
= control target key end

     0   :  { %7 = vsyncpa [#allocation3], 0  ;;  %s273_s0 = inlined_call_operand.hbm [shape: f32[8,128], index: 0, kind: input, shape index: {}]   ;;  %s274_s1 = inlined_call_operand.hbm [shape: f32[8,128], index: 1, kind: input, shape index: {}]   ;;  %s275_s2 = inlined_call_operand.hbm [shape: f32[1,1,128], index: 2, kind: output, shape index: {}]  }
   0x1   :  { %8 = vsyncpa [#allocation6], 0 }
   0x2   :  { %9 = vsyncpa [#allocation4], 0  ;;  %s218_s9 = smov [#allocation2]   ;;  %s219_s11 = smov [#allocation5]  }
   0x3   :  { %s21_s10 = sshll.u32 %s218_s9, 4  ;;  %s36_s12 = sshll.u32 %s219_s11, 4  ;;  %s22_s10 = int_to_ptr.vmem [resolvable:$true] %s21_s10  ;;  %s37_s12 = int_to_ptr.vmem [resolvable:$true] %s36_s12 }
   0x4   :  { %s146_s15 = scalar_lea.hbm %s273_s0, 128 }
   0x5   :  { %p147_p0 = scmp.ne.s32.totalorder %s273_s0, %s146_s15  ;;  %p150_p1 = scmp.lt.u32.totalorder %s146_s15, %s273_s0 }
   0x7   :  { %p152_p2 = pnand %p150_p1, %p147_p0 }
   0x9   :  { %155 = shalt.err (!%p152_p2)
}
   0xa   :  { %s156_s20 = scalar_lea.vmem %s22_s10, 128  ;;  %p161_p4 = scmp.lt.s32.totalorder %s22_s10, %s22_s10 }
   0xb   :  { %p157_p3 = scmp.ne.s32.totalorder %s22_s10, %s156_s20  ;;  %p162_p5 = scmp.lt.s32.totalorder %s156_s20, %s156_s20 }
   0xd   :  { %p163_p6 = por %p162_p5, %p161_p4 }
   0xf   :  { %p164_p7 = pnand %p163_p6, %p157_p3 }
  0x11   :  { %167 = shalt.err (!%p164_p7)
}
  0x12   :  { %24 = dma.hbm_to_vmem [thread:$0]  %s273_s0, 128, %s22_s10, [#allocation3]  }
  0x13   :  { %s168_s25 = scalar_lea.hbm %s274_s1, 128 }
  0x14   :  { %p169_p8 = scmp.ne.s32.totalorder %s274_s1, %s168_s25  ;;  %p172_p9 = scmp.lt.u32.totalorder %s168_s25, %s274_s1 }
  0x16   :  { %p174_p10 = pnand %p172_p9, %p169_p8 }
  0x18   :  { %177 = shalt.err (!%p174_p10)
}
  0x19   :  { %s178_s30 = scalar_lea.vmem %s37_s12, 128  ;;  %p183_p12 = scmp.lt.s32.totalorder %s37_s12, %s37_s12 }
  0x1a   :  { %p179_p11 = scmp.ne.s32.totalorder %s37_s12, %s178_s30  ;;  %p184_p13 = scmp.lt.s32.totalorder %s178_s30, %s178_s30 }
  0x1c   :  { %p185_p0 = por %p184_p13, %p183_p12 }
  0x1e   :  { %p186_p1 = pnand %p185_p0, %p179_p11 }
  0x20   :  { %189 = shalt.err (!%p186_p1)
}
  0x21   :  { %39 = dma.hbm_to_vmem [thread:$0]  %s274_s1, 128, %s37_s12, [#allocation6]  }
  0x22   :  { %212 = dma.done.wait [#allocation3], 128  }
  0x23   :  { %213 = vsyncadd [#allocation3], 4294967168 }
  0x24   :  { %214 = dma.done.wait [#allocation6], 128  }
  0x25   :  { %215 = vsyncadd [#allocation6], 4294967168  ;;  %v220_v0 = vmov 0.0   ;;  %v61_v1 = vld [vmem:[#allocation5] sm:$0xff]  ;;  %v59_v2 = vld [vmem:[#allocation2] sm:$0xff]  ;;  %s221_s1 = smov [#allocation7]  }
  0x26   :  { %105 = vst [vmem:[#allocation7] sm:$0x1] %v220_v0  ;;  %v62_v3 = vmul.f32 0.5, %v61_v1  ;;  %v60_v4 = vmul.f32 0.5, %v59_v2  ;;  %s116_s4 = sshll.u32 %s221_s1, 4  ;;  %s117_s4 = int_to_ptr.vmem [resolvable:$true] %s116_s4 }
  0x27   :  { %s190_s6 = scalar_lea.vmem %s117_s4, 16  ;;  %s194_s7 = scalar_lea.vmem %s117_s4, 32 }
  0x28   :  { %77 = vmax.xlane.f32.xlu0 %v62_v3  ;;  %p191_p2 = scmp.ne.s32.totalorder %s117_s4, %s190_s6  ;;  %p195_p3 = scmp.lt.s32.totalorder %s117_s4, %s117_s4 }
  0x29   :  { %p196_p4 = scmp.lt.s32.totalorder %s194_s7, %s190_s6 }
  0x2b   :  { %p197_p5 = por %p196_p4, %p195_p3 }
  0x2c   :  { %67 = vmax.xlane.f32.xlu0 %v60_v4 }
  0x2d   :  { %v106_v32 = vld [vmem:[#allocation7] sm:$0x1]  ;;  %p198_p6 = pnand %p197_p5, %p191_p2 }
  0xb5   :  { %v78_v5 = vpop.xlane.xlu0 %77 }
  0xb6   :  { %v79_v6 = vsub.f32 %v62_v3, %v78_v5 }
  0xb8   :  { %v80_v7 = vmul.f32 1.442695, %v79_v6 }
  0xb9   :  { %v68_v8 = vpop.xlane.xlu0 %67 }
  0xba   :  { %136 = vpow2.f32 %v80_v7  ;;  %v69_v9 = vsub.f32 %v60_v4, %v68_v8 }
  0xbc   :  { %v70_v10 = vmul.f32 1.442695, %v69_v9 }
  0xbe   :  { %138 = vpow2.f32 %v70_v10 }
  0xc4   :  { %v137_v11 = vpop.eup %136 }
  0xc5   :  { %82 = vadd.xlane.f32.xlu1 %v137_v11 }
  0xc8   :  { %v139_v12 = vpop.eup %138 }
  0xc9   :  { %72 = vadd.xlane.f32.xlu1 %v139_v12 }
 0x152   :  { %v83_v13 = vpop.xlane.xlu1 %82 }
 0x153   :  { %140 = vrcp.f32 %v83_v13 }
 0x156   :  { %v73_v14 = vpop.xlane.xlu1 %72 }
 0x157   :  { %142 = vlog2.f32 %v73_v14 }
 0x15d   :  { %v141_v15 = vpop.eup %140 }
 0x15e   :  { %v85_v16 = vmul.f32 %v141_v15, %v137_v11 }
 0x160   :  { %v86_v17 = vadd.f32 1e-07, %v85_v16 }
 0x161   :  { %v143_v18 = vpop.eup %142 }
 0x162   :  { %144 = vlog2.f32 %v86_v17  ;;  %v75_v19 = vmul.f32 0.6931472, %v143_v18 }
 0x164   :  { %v76_v21 = vsub.f32 %v69_v9, %v75_v19 }
 0x16c   :  { %v145_v20 = vpop.eup %144 }
 0x16d   :  { %v88_v22 = vmul.f32 0.6931472, %v145_v20 }
 0x16f   :  { %v89_v23 = vsub.f32 %v88_v22, %v76_v21 }
 0x171   :  { %v90_v24 = vmul.f32 %v89_v23, %v86_v17 }
 0x173   :  { %92 = vadd.xlane.f32.xlu0 %v90_v24 }
 0x200   :  { %v93_v25 = vpop.xlane.xlu0 %92 }
 0x201   :  { %v94_v26 = vrot.slane %v93_v25, 4 }
 0x203   :  { %v95_v27 = vadd.f32 %v94_v26, %v93_v25 }
 0x205   :  { %v96_v28 = vrot.slane %v95_v27, 2 }
 0x207   :  { %v97_v29 = vadd.f32 %v96_v28, %v95_v27 }
 0x209   :  { %v98_v30 = vrot.slane %v97_v29, 1 }
 0x20b   :  { %v99_v31 = vadd.f32 %v98_v30, %v97_v29 }
 0x20d   :  { %130 = vpush %v99_v31 }
 0x23e   :  { %s131_s5 = spop %130 }
 0x23f   :  { %v107_v33 = vstv %s131_s5 }
 0x240   :  { %v108_v34 = vadd.f32 %v107_v33, %v106_v32 }
 0x242   :  { %109 = vst [vmem:[#allocation7] sm:$0x1] %v108_v34 }
 0x243   :  { %201 = shalt.err (!%p198_p6)
}
 0x244   :  { %s202_s10 = scalar_lea.hbm %s275_s2, 16 }
 0x245   :  { %p203_p7 = scmp.ne.s32.totalorder %s275_s2, %s202_s10  ;;  %p206_p8 = scmp.lt.u32.totalorder %s202_s10, %s275_s2 }
 0x247   :  { %p208_p9 = pnand %p206_p8, %p203_p7 }
 0x249   :  { %211 = shalt.err (!%p208_p9)
}
 0x24a   :  { %119 = dma.vmem_to_hbm [thread:$0]  %s117_s4, 16, %s275_s2, [#allocation4]  }
 0x24b   :  { %216 = dma.done.wait [#allocation4], 16  }
 0x24c   :  { %217 = vsyncadd [#allocation4], 4294967280 }
 0x24d   :  { %123 = vsyncpa [#allocation3], 1 }
 0x24e   :  { %124 = vsyncpa [#allocation6], 1 }
 0x24f   :  { %125 = vsyncpa [#allocation4], 1 }

</bundles_post_ra>
